<compile_context>
chip_gen: v5e
topology: v5e:2x2
jax: 0.10.0
libtpu: 0.0.40
codegen_flags: <defaults>
</compile_context>

<pallas_src>
import math

import jax
import jax.numpy as jnp
from jax import lax
from jax.experimental import pallas as pl
from jax.experimental.pallas import tpu as pltpu


# -----------------------------------------------------------------------------
# helpers
# -----------------------------------------------------------------------------
def _uniform(key, shape, bound):
    return jax.random.uniform(key, shape, jnp.float32, -bound, bound)


def _vmem_capacity_bytes():
    # Per-chip VMEM capacity (v5e/v6e: 128 MiB, v7x: 64 MiB per TensorCore).
    try:
        return int(pltpu.get_tpu_info().vmem_capacity_bytes)
    except Exception:
        return 64 * 2 ** 20          # conservative fallback (v7x per-TC VMEM)


def _maybe_vmem_limit(need_bytes):
    # Only raise the scoped limit when the default would not fit; cap at 75% of
    # the chip's physical VMEM so Mosaic keeps internal scratch headroom.
    if need_bytes <= 12 * 2 ** 20:
        return None
    cap = int(0.75 * _vmem_capacity_bytes())
    return int(min(need_bytes + 8 * 2 ** 20, cap))


# -----------------------------------------------------------------------------
# Pallas kernel 1: 1x1 conv over NCHW as (C, pixels) matmul, fused epilogues
# -----------------------------------------------------------------------------
def _make_conv1x1_kernel(*, fuse_in_relu, has_residual, eps):
    def kernel(*refs):
        if has_residual:
            x_ref, r_ref, w_ref, b_ref, o_ref = refs
        else:
            x_ref, w_ref, b_ref, o_ref = refs
            r_ref = None
        x = x_ref[...][0]                                       # (C_in, T)
        y = jnp.dot(w_ref[...], x, preferred_element_type=jnp.float32)
        y = y + b_ref[...]                                      # (C_out, T) f32
        if fuse_in_relu:
            # InstanceNorm over the full per-sample map (T == H*W, no padded
            # lanes on this path) + ReLU, all in-register in f32.
            mean = jnp.mean(y, axis=1, keepdims=True)
            var = jnp.mean(jnp.square(y - mean), axis=1, keepdims=True)
            y = jnp.maximum((y - mean) * lax.rsqrt(var + eps), 0.0)
        if r_ref is not None:
            # Residual is added after the (optional) IN+ReLU epilogue:
            #   - skip projection: fuse_in_relu=False -> conv + b + r
            #   - identity skip:   fuse_in_relu=True  -> relu(IN(conv+b)) + r
            y = y + r_ref[...][0].astype(jnp.float32)
        o_ref[...] = y[None].astype(o_ref.dtype)
    return kernel


def conv1x1_nchw(x, weight, bias, *, residual=None, fuse_in_relu=False,
                 eps=1e-5, stream_dtype=None, out_dtype=None, tile_pix=2048):
    """1x1 conv (+bias) on NCHW input with optional fused IN+ReLU and residual.

    x:        (N, C_in, H, W)
    weight:   (C_out, C_in) or (C_out, C_in, 1, 1)
    bias:     (C_out,)
    residual: optional (N, C_out, H, W); added AFTER the IN+ReLU epilogue when
              fuse_in_relu is set, otherwise straight after the bias.
    """
    N, C_in, H, W = x.shape
    w2 = weight.reshape(weight.shape[0], -1)
    C_out = w2.shape[0]
    assert w2.shape[1] == C_in
    hw = H * W

    compute_dtype = jnp.dtype(stream_dtype) if stream_dtype is not None else x.dtype
    out_dtype = jnp.dtype(out_dtype) if out_dtype is not None else compute_dtype

    # ---- pixel tiling: never materialize jnp.pad / trailing-slice copies ----
    tile_pix = max(int(tile_pix), 128)
    in_item = jnp.dtype(compute_dtype).itemsize
    out_item = jnp.dtype(out_dtype).itemsize
    # Prefer a full-map block when IN+ReLU fusion is requested and it fits.
    fuse_budget = 24 * 2 ** 20
    per_pix_bytes = in_item * (C_in + C_out) + out_item * C_out
    full_map_ok = 2 * hw * per_pix_bytes <= fuse_budget
    if (fuse_in_relu and full_map_ok) or hw <= tile_pix or hw % 128 != 0:
        tile = hw                      # full-extent last dim is always legal
    else:
        t = (tile_pix // 128) * 128    # largest multiple of 128 <= tile_pix
        while hw % t:                  # ... that divides hw (hw % 128 == 0 here)
            t -= 128
        tile = t
    n_tiles = hw // tile
    fuse = fuse_in_relu and n_tiles == 1
    fuse_residual = (residual is not None) and (fuse or not fuse_in_relu)
    kernel_out_dtype = out_dtype if (fuse or not fuse_in_relu) else jnp.float32

    # NCHW -> (N, C, H*W) is a free reshape; bf16 streaming halves HBM bytes.
    xr = x.reshape(N, C_in, hw).astype(compute_dtype)
    w2 = w2.astype(compute_dtype)
    b2 = bias.reshape(C_out, 1).astype(jnp.float32)
    rr = None
    if fuse_residual:
        rr = residual.reshape(N, C_out, hw).astype(compute_dtype)

    # Grid: (sample, pixel-tile). Both parallel -> shardable over v7x's 2 TCs.
    grid = (N, n_tiles)
    x_spec = pl.BlockSpec((1, C_in, tile), lambda n, t: (n, 0, t))
    r_spec = pl.BlockSpec((1, C_out, tile), lambda n, t: (n, 0, t))
    w_spec = pl.BlockSpec((C_out, C_in), lambda n, t: (0, 0))   # grid-invariant
    b_spec = pl.BlockSpec((C_out, 1), lambda n, t: (0, 0))
    o_spec = pl.BlockSpec((1, C_out, tile), lambda n, t: (n, 0, t))

    bytes_accessed = (in_item * (N * hw * C_in + C_out * C_in) + 4 * C_out
                      + jnp.dtype(kernel_out_dtype).itemsize * N * hw * C_out)
    if rr is not None:
        bytes_accessed += in_item * N * hw * C_out
    cost = pl.CostEstimate(flops=2 * N * hw * C_in * C_out,
                           transcendentals=(N * C_out if fuse else 0),
                           bytes_accessed=int(bytes_accessed))

    step_bytes = (in_item * tile * (C_in + (C_out if rr is not None else 0))
                  + jnp.dtype(kernel_out_dtype).itemsize * tile * C_out)
    weight_bytes = in_item * C_out * C_in + 4 * C_out
    vmem_limit = _maybe_vmem_limit(2 * step_bytes + 2 * weight_bytes)

    kernel = _make_conv1x1_kernel(fuse_in_relu=fuse, has_residual=rr is not None,
                                  eps=eps)
    if rr is None:
        in_specs, operands = [x_spec, w_spec, b_spec], (xr, w2, b2)
    else:
        in_specs, operands = [x_spec, r_spec, w_spec, b_spec], (xr, rr, w2, b2)

    out = pl.pallas_call(
        kernel,
        out_shape=jax.ShapeDtypeStruct((N, C_out, hw), kernel_out_dtype),
        grid_spec=pltpu.PrefetchScalarGridSpec(
            num_scalar_prefetch=0,
            grid=grid,
            in_specs=in_specs,
            out_specs=o_spec,
        ),
        compiler_params=pltpu.CompilerParams(
            dimension_semantics=("parallel", "parallel"),
            vmem_limit_bytes=vmem_limit),
        cost_estimate=cost,
    )(*operands)

    out = out.reshape(N, C_out, H, W)
    if fuse_in_relu and not fuse:
        # Fallback for maps too large to fuse: IN+ReLU (and residual) in XLA.
        out = jnp.maximum(instance_norm(out, eps), 0.0)
        if residual is not None:
            out = out + residual.astype(out.dtype)
        out = out.astype(out_dtype)
    return out


# -----------------------------------------------------------------------------
# Pallas kernel 2: fused InstanceNorm + ReLU (epilogue for the 3x3-conv branch)
# -----------------------------------------------------------------------------
def _make_in_relu_kernel(*, eps):
    def kernel(x_ref, o_ref):
        x = x_ref[...][0].astype(jnp.float32)                   # (C, H*W)
        mean = jnp.mean(x, axis=1, keepdims=True)
        var = jnp.mean(jnp.square(x - mean), axis=1, keepdims=True)
        y = jnp.maximum((x - mean) * lax.rsqrt(var + eps), 0.0)
        o_ref[...] = y[None].astype(o_ref.dtype)
    return kernel


def in_relu_nchw(x, *, eps=1e-5, out_dtype=None, max_block_bytes=16 * 2 ** 20):
    N, C, H, W = x.shape
    hw = H * W
    out_dtype = jnp.dtype(out_dtype) if out_dtype is not None else x.dtype
    if (x.dtype.itemsize + out_dtype.itemsize) * C * hw * 2 > max_block_bytes:
        # TODO(synk): multi-tile IN (two-pass statistics) not implemented; XLA fallback.
        return jnp.maximum(instance_norm(x, eps), 0.0).astype(out_dtype)
    xr = x.reshape(N, C, hw)
    out = pl.pallas_call(
        _make_in_relu_kernel(eps=eps),
        out_shape=jax.ShapeDtypeStruct((N, C, hw), out_dtype),
        grid_spec=pltpu.PrefetchScalarGridSpec(
            num_scalar_prefetch=0,
            grid=(N,),
            in_specs=[pl.BlockSpec((1, C, hw), lambda n: (n, 0, 0))],
            out_specs=pl.BlockSpec((1, C, hw), lambda n: (n, 0, 0)),
        ),
        compiler_params=pltpu.CompilerParams(dimension_semantics=("parallel",)),
        cost_estimate=pl.CostEstimate(
            flops=6 * N * C * hw, transcendentals=N * C,
            bytes_accessed=int((x.dtype.itemsize + out_dtype.itemsize) * N * C * hw)),
    )(xr)
    return out.reshape(N, C, H, W)


# -----------------------------------------------------------------------------
# Pallas kernel 3: fused FC head  y = sigmoid(relu(x @ W1 + b1) @ W2 + b2)
# -----------------------------------------------------------------------------
def _fc_head_kernel(x_ref, w1_ref, b1_ref, w2_ref, b2_ref, o_ref):
    x = x_ref[...].astype(jnp.float32)
    h = jnp.dot(x, w1_ref[...], preferred_element_type=jnp.float32) + b1_ref[...]
    h = jnp.maximum(h, 0.0)
    y = jnp.dot(h, w2_ref[...], preferred_element_type=jnp.float32) + b2_ref[...]
    o_ref[...] = (1.0 / (1.0 + jnp.exp(-y))).astype(o_ref.dtype)   # sigmoid on EUP


def fc_head(x, w1, b1, w2, b2):
    """sigmoid(relu(x @ w1 + b1) @ w2 + b2) in a single kernel launch."""
    N, K = x.shape
    F1, F2 = w1.shape[1], w2.shape[1]
    b1r = b1.reshape(1, F1).astype(jnp.float32)
    b2r = b2.reshape(1, F2).astype(jnp.float32)
    return pl.pallas_call(
        _fc_head_kernel,
        out_shape=jax.ShapeDtypeStruct((N, F2), jnp.float32),
        grid_spec=pltpu.PrefetchScalarGridSpec(
            num_scalar_prefetch=0,
            grid=(1,),
            in_specs=[pl.BlockSpec((N, K), lambda i: (0, 0)),
                      pl.BlockSpec((K, F1), lambda i: (0, 0)),
                      pl.BlockSpec((1, F1), lambda i: (0, 0)),
                      pl.BlockSpec((F1, F2), lambda i: (0, 0)),
                      pl.BlockSpec((1, F2), lambda i: (0, 0))],
            out_specs=pl.BlockSpec((N, F2), lambda i: (0, 0)),
        ),
        compiler_params=pltpu.CompilerParams(dimension_semantics=("arbitrary",)),
        cost_estimate=pl.CostEstimate(
            flops=2 * N * (K * F1 + F1 * F2),
            transcendentals=N * F2,
            bytes_accessed=int(x.dtype.itemsize * N * K
                               + 4 * (K * F1 + F1 + F1 * F2 + F2 + N * F2))),
    )(x, w1, b1r, w2, b2r)


# -----------------------------------------------------------------------------
# Non-Pallas glue ops (same math as the PyTorch modules)
# -----------------------------------------------------------------------------
def conv3x3_nchw(x, weight, bias):
    # TODO(synk): the 3x3 conv stays on XLA (lax.conv_general_dilated); no Pallas im2col kernel.
    y = lax.conv_general_dilated(
        x, weight.astype(x.dtype), window_strides=(1, 1), padding=((1, 1), (1, 1)),
        dimension_numbers=("NCHW", "OIHW", "NCHW"),
        preferred_element_type=jnp.float32)
    return y + bias[None, :, None, None]


def instance_norm(x, eps=1e-5):
    # nn.InstanceNorm2d(affine=False): per-(sample, channel) stats over H, W.
    xf = x.astype(jnp.float32)
    mean = jnp.mean(xf, axis=(2, 3), keepdims=True)
    var = jnp.var(xf, axis=(2, 3), keepdims=True)
    return ((xf - mean) * lax.rsqrt(var + eps)).astype(x.dtype)


def max_pool_2x2(x):
    # nn.MaxPool2d(2, 2), floor mode.  TODO(synk): kept in plain jnp (cheap, memory-bound).
    N, C, H, W = x.shape
    x = x[:, :, : (H // 2) * 2, : (W // 2) * 2]
    return x.reshape(N, C, H // 2, 2, W // 2, 2).max(axis=(3, 5))


# -----------------------------------------------------------------------------
# Modules (JAX ports of the PyTorch classes)
# -----------------------------------------------------------------------------
class ConvBnRelu:
    def __init__(self, key, in_channels, out_channels, kernel_size=1, padding=0):
        self.kernel_size = kernel_size
        kw, kb = jax.random.split(key)
        bound = 1.0 / math.sqrt(in_channels * kernel_size * kernel_size)
        self.w = _uniform(kw, (out_channels, in_channels, kernel_size, kernel_size), bound)
        self.b = _uniform(kb, (out_channels,), bound)

    def __call__(self, x, residual_after=None):
        if self.kernel_size == 1:
            # conv + bias + InstanceNorm + ReLU (+ residual) in one Pallas pass.
            return conv1x1_nchw(x, self.w, self.b, residual=residual_after,
                                fuse_in_relu=True)
        y = conv3x3_nchw(x, self.w, self.b)
        y = in_relu_nchw(y, out_dtype=x.dtype)
        if residual_after is not None:
            y = y + residual_after.astype(y.dtype)
        return y


class ConvTripleBlock:
    def __init__(self, key, in_channels, out_channels):
        half = out_channels // 2
        k1, k2, k3 = jax.random.split(key, 3)
        self.block1 = ConvBnRelu(k1, in_channels, half, 1)
        self.block2 = ConvBnRelu(k2, half, half, 3, padding=1)
        self.block3 = ConvBnRelu(k3, half, out_channels, 1)

    def __call__(self, x, residual_after=None):
        # The residual add is fused into block3's kernel epilogue.
        return self.block3(self.block2(self.block1(x)), residual_after=residual_after)


class SkipLayer:
    def __init__(self, key, in_channels, out_channels):
        self.in_channels = in_channels
        self.out_channels = out_channels
        self.is_identity = in_channels == out_channels
        if not self.is_identity:
            kw, kb = jax.random.split(key)
            bound = 1.0 / math.sqrt(in_channels)
            self.w = _uniform(kw, (out_channels, in_channels, 1, 1), bound)
            self.b = _uniform(kb, (out_channels,), bound)

    def __call__(self, x, residual=None):
        if not self.is_identity:
            # Residual add fused into the 1x1 projection kernel (no extra pass).
            return conv1x1_nchw(x, self.w, self.b, residual=residual)
        return x if residual is None else x + residual


class Residual:
    def __init__(self, key, in_channels, out_channels):
        kc, ks = jax.random.split(key)
        self.convblock = ConvTripleBlock(kc, in_channels, out_channels)
        self.skip = SkipLayer(ks, in_channels, out_channels)

    def __call__(self, x):
        if self.skip.is_identity:
            # out = relu(IN(conv3(...))) + x  -- "+ x" fused into block3's kernel.
            return self.convblock(x, residual_after=x)
        y = self.convblock(x)
        return self.skip(x, residual=y)          # == y + skip(x)


class Discriminator:
    def __init__(self, key, in_channels, num_channels, num_residuals,
                 heatmap_size, num_joints, stream_dtype=None):
        self.num_residuals = num_residuals
        self.stream_dtype = stream_dtype          # e.g. jnp.bfloat16 for streaming
        keys = jax.random.split(key, num_residuals + 2)
        self.residual = [Residual(keys[0], in_channels, num_channels)]
        for i in range(1, num_residuals):
            self.residual.append(Residual(keys[i], num_channels, num_channels))
        h, w = heatmap_size
        fc1_in = num_channels * (h // 2 ** (num_residuals - 1)) * (w // 2 ** (num_residuals - 1))
        kw1, kb1 = jax.random.split(keys[num_residuals])
        kw2, kb2 = jax.random.split(keys[num_residuals + 1])
        bound1 = 1.0 / math.sqrt(fc1_in)
        bound2 = 1.0 / math.sqrt(128)
        # fc weights stored as (in_features, out_features): no transposes anywhere.
        self.fc1_w = _uniform(kw1, (fc1_in, 128), bound1)
        self.fc1_b = _uniform(kb1, (128,), bound1)
        self.fc2_w = _uniform(kw2, (128, num_joints), bound2)
        self.fc2_b = _uniform(kb2, (128,), bound2)[:num_joints] * 0 + _uniform(kb2, (num_joints,), bound2)

    def __call__(self, x):
        if self.stream_dtype is not None:
            # bf16 activation streaming: halves HBM bytes per layer; all matmul
            # accumulation and IN statistics stay in f32 inside the kernels.
            x = x.astype(self.stream_dtype)
        x = self.residual[0](x)
        for i in range(1, self.num_residuals):
            x = self.residual[i](x)
            x = max_pool_2x2(x)
        x = x.reshape(x.shape[0], -1)
        # fc1 -> relu -> fc2 -> sigmoid collapsed into one Pallas kernel.
        return fc_head(x, self.fc1_w, self.fc1_b, self.fc2_w, self.fc2_b)


# -----------------------------------------------------------------------------
# Pure-XLA reference (same weights, jnp matmuls) for correctness checking
# -----------------------------------------------------------------------------
def _ref_conv1x1(x, weight, bias):
    w2 = weight.reshape(weight.shape[0], -1)
    return jnp.einsum("oi,nihw->nohw", w2, x) + bias[None, :, None, None]


def _ref_conv_bn_relu(blk, x):
    if blk.kernel_size == 1:
        y = _ref_conv1x1(x, blk.w, blk.b)
    else:
        y = conv3x3_nchw(x, blk.w, blk.b)
    return jnp.maximum(instance_norm(y), 0.0)


def _ref_residual(res, x):
    y = x
    for blk in (res.convblock.block1, res.convblock.block2, res.convblock.block3):
        y = _ref_conv_bn_relu(blk, y)
    z = x if res.skip.is_identity else _ref_conv1x1(x, res.skip.w, res.skip.b)
    return y + z


def _reference_forward(disc, x):
    x = _ref_residual(disc.residual[0], x)
    for i in range(1, disc.num_residuals):
        x = _ref_residual(disc.residual[i], x)
        x = max_pool_2x2(x)
    x = x.reshape(x.shape[0], -1)
    x = jnp.maximum(x @ disc.fc1_w + disc.fc1_b, 0.0)
    x = x @ disc.fc2_w + disc.fc2_b
    return jax.nn.sigmoid(x)


if __name__ == "__main__":
    key = jax.random.PRNGKey(0)
    kx, kmodel, kw_u, kb_u = jax.random.split(key, 4)

    # Small config consistent with the module: confidence-discriminator input
    # channels = num_joints * 2, RES_CHANNEL = 32, NUM_RES = 2, heatmap 16x16.
    batch, num_joints = 2, 4
    in_channels = num_joints * 2
    H = W = 16
    x = jax.random.normal(kx, (batch, in_channels, H, W), jnp.float32)

    disc = Discriminator(kmodel, in_channels=in_channels, num_channels=32,
                         num_residuals=2, heatmap_size=(H, W),
                         num_joints=num_joints)

    # --- f32 path: strict end-to-end check against the pure-XLA reference ---
    y = jax.block_until_ready(disc(x))
    ref = jax.block_until_ready(_reference_forward(disc, x))
    assert y.shape == (batch, num_joints)
    assert bool(jnp.all(jnp.isfinite(y)))
    assert bool(jnp.all((y >= 0.0) & (y <= 1.0)))
    assert jnp.allclose(y, ref, atol=5e-3, rtol=5e-3), float(jnp.max(jnp.abs(y - ref)))

    # --- bf16-streaming path: same weights, loose tolerance (bf16 HBM traffic) ---
    disc.stream_dtype = jnp.bfloat16
    y_bf16 = jax.block_until_ready(disc(x))
    assert y_bf16.shape == (batch, num_joints)
    assert bool(jnp.all(jnp.isfinite(y_bf16)))
    assert float(jnp.max(jnp.abs(y_bf16 - ref))) < 0.15
    disc.stream_dtype = None

    # --- direct unit checks of the 1x1-conv Pallas kernel ---
    w_u = _uniform(kw_u, (32, in_channels, 1, 1), 0.3)
    b_u = _uniform(kb_u, (32,), 0.3)
    y_u = jax.block_until_ready(conv1x1_nchw(x, w_u, b_u))
    r_u = _ref_conv1x1(x, w_u, b_u)
    assert jnp.allclose(y_u, r_u, atol=2e-3, rtol=2e-3), float(jnp.max(jnp.abs(y_u - r_u)))

    y_f = jax.block_until_ready(conv1x1_nchw(x, w_u, b_u, fuse_in_relu=True))
    r_f = jnp.maximum(instance_norm(r_u), 0.0)
    assert jnp.allclose(y_f, r_f, atol=2e-3, rtol=2e-3), float(jnp.max(jnp.abs(y_f - r_f)))

    print("KERNEL_OK")
</pallas_src>

<mosaic_0001>
module attributes {stable_mosaic.version = 11 : i64} {
  func.func @kernel(%arg0: i32, %arg1: i32, %arg2: memref<1x8x256xf32, #tpu.memory_space<vmem>>, %arg3: memref<16x8xf32, #tpu.memory_space<vmem>>, %arg4: memref<16x1xf32, #tpu.memory_space<vmem>>, %arg5: memref<1x16x256xf32, #tpu.memory_space<vmem>>) attributes {dimension_semantics = [#tpu.dimension_semantics<parallel>, #tpu.dimension_semantics<parallel>], iteration_bounds = array<i64: 2, 1>, scalar_prefetch = 0 : i64, scratch_operands = 0 : i64, tpu.core_type = #tpu.core_type<tc>, window_params = [{transform_indices = @transform_0, window_bounds = array<i64: 1, 8, 256>}, {pipeline_mode = #tpu.pipeline_mode<synchronous>, transform_indices = @transform_1, window_bounds = array<i64: 16, 8>}, {pipeline_mode = #tpu.pipeline_mode<synchronous>, transform_indices = @transform_2, window_bounds = array<i64: 16, 1>}, {transform_indices = @transform_3, window_bounds = array<i64: 1, 16, 256>}]} {
    %c0 = arith.constant 0 : index
    %c0_0 = arith.constant 0 : index
    %c0_1 = arith.constant 0 : index
    %0 = vector.load %arg2[%c0, %c0_0, %c0_1] : memref<1x8x256xf32, #tpu.memory_space<vmem>>, vector<1x8x256xf32>
    %1 = vector.shape_cast %0 : vector<1x8x256xf32> to vector<8x256xf32>
    %c0_2 = arith.constant 0 : index
    %c0_3 = arith.constant 0 : index
    %2 = vector.load %arg3[%c0_2, %c0_3] : memref<16x8xf32, #tpu.memory_space<vmem>>, vector<16x8xf32>
    %cst = arith.constant dense<0.000000e+00> : vector<16x256xf32>
    %3 = tpu.matmul %2, %1, %cst {dimension_numbers = #tpu.dot_dimension_numbers<[1], [0], [0], [1], [0, 0, 1, 1], [], []>} : vector<16x8xf32>, vector<8x256xf32>, vector<16x256xf32> -> vector<16x256xf32>
    %c0_4 = arith.constant 0 : index
    %c0_5 = arith.constant 0 : index
    %4 = vector.load %arg4[%c0_4, %c0_5] : memref<16x1xf32, #tpu.memory_space<vmem>>, vector<16x1xf32>
    %5 = vector.broadcast %4 : vector<16x1xf32> to vector<16x256xf32>
    %6 = arith.addf %3, %5 : vector<16x256xf32>
    %cst_6 = arith.constant dense<0.000000e+00> : vector<16xf32>
    %7 = vector.multi_reduction <add>, %6, %cst_6 [1] : vector<16x256xf32> to vector<16xf32>
    %8 = vector.shape_cast %7 : vector<16xf32> to vector<16x1xf32>
    %cst_7 = arith.constant 2.560000e+02 : f32
    %9 = vector.broadcast %cst_7 : f32 to vector<16x1xf32>
    %10 = arith.divf %8, %9 : vector<16x1xf32>
    %11 = vector.broadcast %10 : vector<16x1xf32> to vector<16x256xf32>
    %12 = arith.subf %6, %11 : vector<16x256xf32>
    %13 = arith.mulf %12, %12 : vector<16x256xf32>
    %cst_8 = arith.constant dense<0.000000e+00> : vector<16xf32>
    %14 = vector.multi_reduction <add>, %13, %cst_8 [1] : vector<16x256xf32> to vector<16xf32>
    %15 = vector.shape_cast %14 : vector<16xf32> to vector<16x1xf32>
    %cst_9 = arith.constant 2.560000e+02 : f32
    %16 = vector.broadcast %cst_9 : f32 to vector<16x1xf32>
    %17 = arith.divf %15, %16 : vector<16x1xf32>
    %18 = vector.broadcast %10 : vector<16x1xf32> to vector<16x256xf32>
    %19 = arith.subf %6, %18 : vector<16x256xf32>
    %cst_10 = arith.constant 9.99999974E-6 : f32
    %20 = vector.broadcast %cst_10 : f32 to vector<16x1xf32>
    %21 = arith.addf %17, %20 : vector<16x1xf32>
    %22 = math.rsqrt %21 : vector<16x1xf32>
    %23 = vector.broadcast %22 : vector<16x1xf32> to vector<16x256xf32>
    %24 = arith.mulf %19, %23 : vector<16x256xf32>
    %cst_11 = arith.constant 0.000000e+00 : f32
    %25 = vector.broadcast %cst_11 : f32 to vector<16x256xf32>
    %26 = arith.maximumf %24, %25 : vector<16x256xf32>
    %27 = vector.shape_cast %26 : vector<16x256xf32> to vector<1x16x256xf32>
    %c0_12 = arith.constant 0 : index
    %c0_13 = arith.constant 0 : index
    %c0_14 = arith.constant 0 : index
    %28 = vector.load %arg5[%c0_12, %c0_13, %c0_14] : memref<1x16x256xf32, #tpu.memory_space<vmem>>, vector<1x16x256xf32>
    tpu.vector_store %arg5[%c0_12, %c0_13, %c0_14], %27 {strides = array<i32>} : memref<1x16x256xf32, #tpu.memory_space<vmem>>, vector<1x16x256xf32>,
    return
  }
  func.func @transform_0(%arg0: i32, %arg1: i32) -> (i32, i32, i32) {
    %c0_i32 = arith.constant 0 : i32
    %c0_i32_0 = arith.constant 0 : i32
    return %arg0, %c0_i32, %arg1 : i32, i32, i32
  }
  func.func @transform_1(%arg0: i32, %arg1: i32) -> (i32, i32) {
    %c0_i32 = arith.constant 0 : i32
    %c0_i32_0 = arith.constant 0 : i32
    %c0_i32_1 = arith.constant 0 : i32
    return %c0_i32, %c0_i32_0 : i32, i32
  }
  func.func @transform_2(%arg0: i32, %arg1: i32) -> (i32, i32) {
    %c0_i32 = arith.constant 0 : i32
    %c0_i32_0 = arith.constant 0 : i32
    %c0_i32_1 = arith.constant 0 : i32
    return %c0_i32, %c0_i32_0 : i32, i32
  }
  func.func @transform_3(%arg0: i32, %arg1: i32) -> (i32, i32, i32) {
    %c0_i32 = arith.constant 0 : i32
    %c0_i32_0 = arith.constant 0 : i32
    return %arg0, %c0_i32, %arg1 : i32, i32, i32
  }
}

</mosaic_0001>

<bundles_post_ra>
// kernel: tpu_custom_call.1
= control target key start
LH: loop header
LB: loop body
LE: loop exit
PB: predicated region body
PF: predicated region fallthrough
CT: control target
= control target key end

     0   :  { %8 = vsyncpa [#allocation3], 0  ;;  %s735_s0 = inlined_call_operand.vmem [shape: f32[2,8,256], index: 0, kind: input, shape index: {}]   ;;  %s736_s1 = inlined_call_operand.vmem [shape: f32[16,8], index: 1, kind: input, shape index: {}]   ;;  %s737_s2 = inlined_call_operand.vmem [shape: f32[16,1], index: 2, kind: input, shape index: {}]   ;;  %s738_s3 = inlined_call_operand.hbm [shape: f32[2,16,256], index: 3, kind: output, shape index: {}]  }
   0x1   :  { %10 = vsyncpa [#allocation3 + $0x1], 0  ;;  %s622_s12 = smov 0   ;;  %s624_s13 = smov 0  }
   0x2   :  { %s626_s14 = smov 0   ;;  %s628_s15 = smov 0  }
   0x3   :  { %s630_s16 = smov 0   ;;  %s632_s17 = smov 0  }
   0x4 LB: > { %s431_s18 = sadd.s32 4294967295, %s596_s17   ;;  %s432_s19 = sadd.s32 4294967294, %s596_s17   ;;  %s596_s17 = sphi %s632_s17, %s16_s17   ;;  %s592_s16 = sphi %s630_s16, %s745_s16   ;;  %s588_s15 = sphi %s628_s15, %s744_s15   ;;  %s584_s14 = sphi %s626_s14, %s743_s14   ;;  %s580_s13 = sphi %s624_s13, %s742_s13   ;;  %s576_s12 = sphi %s622_s12, %s741_s12  }
   0x5   : > { %s28_s20 = sadd.s32 1, %s592_s16  ;;  %s107_s21 = sadd.s32 1, %s584_s14 }
   0x6   : > { %p30_p0 = scmp.ge.s32.totalorder %s28_s20, 2  ;;  %p117_p1 = scmp.ne.s32.totalorder %s584_s14, %s580_s13 }
   0x7   : > { %p118_p2 = scmp.eq.s32.totalorder %s431_s18, 1  ;;  %p123_p3 = scmp.ne.s32.totalorder %s580_s13, %s576_s12 }
   0x8   : > { %s747_s20 = smov (%p30_p0, %s28_s20), 0  ;;  %p124_p5 = scmp.eq.s32.totalorder %s432_s19, 1 }
   0x9   : > { %p662_p4 = por %p118_p2, %p117_p1  ;;  %s102_s23 = ssub.s32 %s592_s16, %s747_s20 }
   0xa   : > { %p435_p6 = scmp.ge.s32.totalorder %s596_s17, 1  ;;  %p105_p7 = scmp.eq.s32.totalorder %s102_s23, 0 }
   0xb   : > { %p669_p8 = por %p124_p5, %p123_p3  ;;  %p161_p9 = scmp.lt.s32.totalorder %s596_s17, 3 }
   0xc   : > { %s675_s25 = scalar_select %p105_p7, %s584_s14, %s107_s21  }
   0xd   : > { %p162_p10 = pnand %p435_p6, %p161_p9 }
   0xe   : > { %p190_p11 = scmp.lt.s32.totalorder (!%p162_p10), %s588_s15, 1  ;;  %s186_s18 = sand.u32 (!%p162_p10), 1, %s580_s13  }
   0xf   : > { %165 = sbr.rel (%p162_p10) target bundleno = 437 (0x1b5), region = 32  ;;  %s436_s19 = sshll.u32 (!%p162_p10), %s186_s18, 5 }
  0x10   : > { %s449_s21 = sshll.u32 (!%p162_p10), %s588_s15, 5  ;;  %s188_s23 = scalar_lea.vmem (!%p162_p10), [#allocation2], %s436_s19 }
  0x11   : > { %s538_s8 = scalar_lea.hbm (!%p162_p10), %s738_s3, 64 }
  0x14   : > { %v204_v0 = vld [vmem:[%s737_s2] sm:$0xff]  ;;  %v598_v1 = vmov 0   ;;  %s191_s28 = scalar_select %p190_p11, %s588_s15, 1  ;;  %vm216_vm0 = vcmask 64512   ;;  %v203_v5 = vld [vmem:[%s736_s1 + $0x8] sm:$0xff]  ;;  %v599_v19 = vmov 256.0  }
  0x15   : > { %511 = vset.pattern.permute.xlu0 %v598_v1  ;;  %v202_v2 = vld [vmem:[%s736_s1] sm:$0xff]  ;;  %v205_v6 = vld [vmem:[%s737_s2 + $0x8] sm:$0xff]  ;;  %512 = vrcp.f32 %v599_v19  ;;  %s335_s15 = scalar_lea.sflag [#allocation3], %s186_s18 }
  0x16   : > { %208 = vperm.xlu0 %511, %v204_v0   ;;  %s448_s29 = sshll.u32 %s191_s28, 4  ;;  %s348_s28 = scalar_lea.hbm %s738_s3, %s449_s21 }
  0x17   : > { %s197_s5 = scalar_lea.vmem %s735_s0, %s448_s29  ;;  %s349_s29 = sshll.u32 %s188_s23, 4  ;;  %s350_s29 = int_to_ptr.vmem [resolvable:$true] %s349_s29 }
  0x18   : > { %v200_v3 = vld [vmem:[%s197_s5] sm:$0xff]  ;;  %v201_v4 = vld [vmem:[%s197_s5 + $0x8] sm:$0xff]  ;;  %s351_s30 = sshll.u32 %s348_s28, 4  ;;  %s352_s30 = int_to_ptr.hbm [resolvable:$true] %s351_s30 }
  0x19   : > { %238 = vmatpush.msra.mxu0 %v200_v3  ;;  %450 = vmatpush.msra.mxu2 %v200_v3  ;;  %s532_s4 = sshra.s32 %s352_s30, 4  ;;  %s533_s4 = int_to_ptr.hbm [resolvable:$true] %s532_s4 }
  0x1a   : > { %261 = vmatpush.msra.mxu1 %v201_v4  ;;  %451 = vmatpush.msra.mxu3 %v201_v4  ;;  %s534_s5 = scalar_lea.hbm %s533_s4, 32  ;;  %p539_p1 = scmp.lt.s32.totalorder %s533_s4, %s738_s3 }
  0x1b   : > { %439 = vmatmul.msk.f32.vlgmr.msra.gmra.mxu0 %vm216_vm0, %v202_v2  ;;  %440 = vmatmul.msk.f32.vlgmr.msra.gmra.mxu2 %vm216_vm0, %v203_v5  ;;  %v513_v20 = vpop.eup %512  ;;  %p535_p12 = scmp.ne.s32.totalorder %s533_s4, %s534_s5  ;;  %p540_p2 = scmp.lt.s32.totalorder %s538_s8, %s534_s5 }
  0x1c   : > { %441 = vmatmul.msk.f32.vlgmr.msra.gmra.mxu1 %vm216_vm0, %v202_v2  ;;  %442 = vmatmul.msk.f32.vlgmr.msra.gmra.mxu3 %vm216_vm0, %v203_v5  ;;  %v276_v21 = vmul.f32 256.0, %v513_v20  ;;  %vm280_vm1 = vweird.f32 %v513_v20 }
  0x1d   : > { %p536_p13 = pnand %p535_p12, %p662_p4  ;;  %p541_p3 = por %p540_p2, %p539_p1 }
  0x1e   : > { %213 = vperm.xlu0 %511, %v205_v6   ;;  %v277_v22 = vsub.f32 1.0, %v276_v21 }
  0x1f   : > { %p537_p0 = pneg %p536_p13 }
  0x20   : > { %v278_v23 = vmul.f32 %v513_v20, %v277_v22 }
  0x21   : > { %p542_p5 = pnand %p541_p3, %p537_p0 }
  0x22   : > { %v279_v24 = vadd.f32 %v513_v20, %v278_v23 }
  0x24   : > { %v281_v25 = vsel %vm280_vm1, %v513_v20, %v279_v24 }
  0x88   : > { %v209_v7 = vpop.permute.xlu0 %208 }
  0x90   : > { %v214_v14 = vpop.permute.xlu0 %213 }
  0x98   : > { %v240_v8 = vpop.f32.mrf.mxu0 }
  0x99   : > { %v241_v9 = vadd.f32 %v240_v8, %v209_v7  ;;  %v263_v10 = vpop.f32.mrf.mxu1 }
  0x9a   : > { %v264_v11 = vadd.f32 %v263_v10, %v209_v7 }
  0x9c   : > { %v269_v12 = vadd.f32 %v264_v11, %v241_v9 }
  0x9e   : > { %270 = vadd.xlane.f32.xlu1 %v269_v12  ;;  %v243_v13 = vpop.f32.mrf.mxu2 }
  0x9f   : > { %v266_v15 = vpop.f32.mrf.mxu3  ;;  %v244_v16 = vadd.f32 %v243_v13, %v214_v14 }
  0xa0   : > { %v267_v17 = vadd.f32 %v266_v15, %v214_v14 }
  0xa2   : > { %v272_v18 = vadd.f32 %v267_v17, %v244_v16 }
  0xa6   : > { %273 = vadd.xlane.f32.xlu1 %v272_v18 }
 0x111   : > { %v271_v26 = vpop.xlane.xlu1 %270 }
 0x112   : > { %v282_v27 = vmul.f32 %v281_v25, %v271_v26 }
 0x114   : > { %v284_v28 = vsub.f32 %v241_v9, %v282_v27  ;;  %v285_v29 = vsub.f32 %v264_v11, %v282_v27 }
 0x116   : > { %v288_v30 = vmul.f32 %v284_v28, %v284_v28  ;;  %v289_v31 = vmul.f32 %v285_v29, %v285_v29 }
 0x118   : > { %v292_v32 = vadd.f32 %v289_v31, %v288_v30 }
 0x119   : > { %v274_v33 = vpop.xlane.xlu1 %273 }
 0x11a   : > { %v283_v34 = vmul.f32 %v281_v25, %v274_v33  ;;  %293 = vadd.xlane.f32.xlu2 %v292_v32 }
 0x11c   : > { %v286_v35 = vsub.f32 %v244_v16, %v283_v34  ;;  %v287_v36 = vsub.f32 %v267_v17, %v283_v34 }
 0x11e   : > { %v290_v37 = vmul.f32 %v286_v35, %v286_v35  ;;  %v291_v38 = vmul.f32 %v287_v36, %v287_v36 }
 0x120   : > { %v295_v39 = vadd.f32 %v291_v38, %v290_v37 }
 0x122   : > { %296 = vadd.xlane.f32.xlu2 %v295_v39 }
 0x18d   : > { %v294_v40 = vpop.xlane.xlu2 %293 }
 0x18e   : > { %v298_v41 = vmul.f32 %v294_v40, %v281_v25 }
 0x190   : > { %v300_v42 = vadd.f32 1e-05, %v298_v41 }
 0x192   : > { %514 = vrsqrt.f32 %v300_v42  ;;  %vm308_vm3 = vweird.f32 %v300_v42 }
 0x195   : > { %v297_v43 = vpop.xlane.xlu2 %296 }
 0x196   : > { %v299_v44 = vmul.f32 %v297_v43, %v281_v25 }
 0x198   : > { %v515_v45 = vpop.eup %514  ;;  %v301_v46 = vadd.f32 1e-05, %v299_v44 }
 0x199   : > { %v303_v47 = vmul.f32 %v515_v45, %v300_v42  ;;  %vm309_vm2 = vweird.f32 %v515_v45 }
 0x19a   : > { %516 = vrsqrt.f32 %v301_v46  ;;  %vm310_vm4 = vmor %vm308_vm3, %vm309_vm2  ;;  %vm318_vm6 = vweird.f32 %v301_v46 }
 0x19b   : > { %v304_v48 = vmul.f32 %v515_v45, %v303_v47 }
 0x19d   : > { %v305_v49 = vmul.f32 0.5, %v304_v48 }
 0x19f   : > { %v306_v50 = vsub.f32 1.5, %v305_v49 }
 0x1a0   : > { %v517_v51 = vpop.eup %516 }
 0x1a1   : > { %v307_v52 = vmul.f32 %v515_v45, %v306_v50  ;;  %v313_v53 = vmul.f32 %v517_v51, %v301_v46  ;;  %vm319_vm5 = vweird.f32 %v517_v51 }
 0x1a2   : > { %vm320_vm7 = vmor %vm318_vm6, %vm319_vm5 }
 0x1a3   : > { %v311_v54 = vsel %vm310_vm4, %v515_v45, %v307_v52  ;;  %v314_v55 = vmul.f32 %v517_v51, %v313_v53 }
 0x1a4   : > { %v322_v56 = vmul.f32 %v311_v54, %v284_v28  ;;  %v323_v57 = vmul.f32 %v311_v54, %v285_v29 }
 0x1a5   : > { %v315_v58 = vmul.f32 0.5, %v314_v55 }
 0x1a6   : > { %v326_v59 = vmax.f32 %v322_v56, 0.0  ;;  %v327_v60 = vmax.f32 %v323_v57, 0.0 }
 0x1a7   : > { %v316_v61 = vsub.f32 1.5, %v315_v58 }
 0x1a8   : > { %330 = vst [vmem:[%s188_s23] sm:$0xff] %v326_v59 }
 0x1a9   : > { %331 = vst [vmem:[%s188_s23 + $0x8] sm:$0xff] %v327_v60  ;;  %v317_v62 = vmul.f32 %v517_v51, %v316_v61 }
 0x1ab   : > { %v321_v63 = vsel %vm320_vm7, %v517_v51, %v317_v62 }
 0x1ac   : > { %v324_v0 = vmul.f32 %v321_v63, %v286_v35  ;;  %v325_v1 = vmul.f32 %v321_v63, %v287_v36 }
 0x1ae   : > { %v328_v2 = vmax.f32 %v324_v0, 0.0  ;;  %v329_v3 = vmax.f32 %v325_v1, 0.0 }
 0x1b0   : > { %332 = vst [vmem:[%s188_s23 + $0x10] sm:$0xff] %v328_v2 }
 0x1b1   : > { %333 = vst [vmem:[%s188_s23 + $0x18] sm:$0xff] %v329_v3 }
 0x1b2   : > { %545 = shalt.err (!%p542_p5)
}
 0x1b3   : > { %s600_s11 = smov 256   ;;  %s601_s18 = smov 16  }
 0x1b4   : > { %452 = dma.vmem_to_hbm [thread:$0]  (%p662_p4), %s350_s29, 512, %s352_s30, %s335_s15, %s600_s11, %s600_s11, %s601_s18  }
 0x1b5 PF: > { %p458_p6 = scmp.ge.s32.totalorder %s596_s17, 2  ;;  %s366_s19 = sand.u32 1, %s576_s12  }
 0x1b6   : > { %s367_s21 = scalar_lea.sflag [#allocation3], %s366_s19 }
 0x1b7   : > { %p455_p7 = pnand %p458_p6, %p669_p8 }
 0x1b9   : > { %p456_p9 = pneg %p455_p7 }
 0x1bb   : > { %571 = dma.done.wait (%p456_p9), %s367_s21, 512  }
 0x1bc   : > { %573 = vsyncadd (%p456_p9), %s367_s21, 4294966784  ;;  %s16_s17 = sadd.s32 1, %s596_s17   ;;  %s741_s12 = smov %s580_s13 }
 0x1bd   : > { %p13_p10 = scmp.ge.s32.totalorder %s16_s17, 4   ;;  %s742_s13 = smov %s584_s14 }
 0x1be   : > { %s743_s14 = smov %s675_s25  ;;  %s744_s15 = smov %s592_s16 }
 0x1bf   : > { %s745_s16 = smov %s747_s20  ;;  %15 = sbr.rel (!%p13_p10) target bundleno = 4 (0x4), region = 67 }
 0x1c4   :  { %373 = vsyncpa [#allocation3], 1 }
 0x1c5   :  { %375 = vsyncpa [#allocation3 + $0x1], 1 }

</bundles_post_ra>
